<compile_context>
chip_gen: v5e
topology: v5e:2x2
jax: 0.10.0
libtpu: 0.0.40
codegen_flags: <defaults>
</compile_context>

<pallas_src>
import jax
import jax.numpy as jnp
from jax import lax
from jax.experimental import pallas as pl
from jax.experimental.pallas import tpu as pltpu

KERNEL_SET = (2, 3, 6, 7)      # dilated_inception kernel sizes (time axis)
KMAX = max(KERNEL_SET)


# --------------------------------- kernel ----------------------------------
def _make_tiem_conv_kernel(Cin, Cout, T_out, dilation, tile_m):
    K = KMAX * Cin

    def kernel(x_ref, w_ref, b_ref, o_ref):
        # x_ref: (T*Cin, tile_m)       bf16; row = t*Cin + c  (time-major, channel-minor)
        # w_ref: (2*Cout, KMAX*Cin)    bf16; col = r*Cin + c, r = position inside the
        #                              largest kernel's dilated window (zero-padded where a
        #                              branch with kernel k < KMAX has no tap).
        #                              Rows: [filter Cout | gate Cout].
        # b_ref: (2*Cout, 1)           f32 bias, rows as above
        # o_ref: (T_out, Cout, tile_m) bf16
        w = w_ref[...]                                              # tiny, loaded once
        bias = jnp.broadcast_to(b_ref[...], (2 * Cout, tile_m))     # hoisted lane-broadcast

        for t in range(T_out):                                      # static unroll
            if dilation == 1:
                # window rows [t*Cin, t*Cin + KMAX*Cin) are contiguous -> one dense slice
                xw = x_ref[t * Cin:t * Cin + K, :]                  # (K, tile_m)
            else:
                xw = jnp.concatenate(
                    [x_ref[(t + r * dilation) * Cin:(t + r * dilation) * Cin + Cin, :]
                     for r in range(KMAX)], axis=0)                 # (K, tile_m)
            # single fused filter+gate contraction on the MXU, f32 accumulation
            acc = jnp.dot(w, xw, preferred_element_type=jnp.float32) + bias  # (2Cout, tile_m)
            f = jnp.tanh(acc[:Cout, :])
            g = jax.nn.sigmoid(acc[Cout:, :])
            o_ref[t, :, :] = (f * g).astype(o_ref.dtype)            # full (Cout, tile_m) slab

    return kernel


# ------------------------------ param packing ------------------------------
def _pack_params(filt_params, gate_params, Cin, Ck):
    """Fuse all branches + taps + filter/gate into one zero-padded (2*Cout, KMAX*Cin)
    weight.  Inputs are torch-layout (Ck, Cin, 1, k) weights and (Ck,) biases."""
    Cout = Ck * len(KERNEL_SET)
    W = jnp.zeros((2 * Cout, KMAX * Cin), jnp.float32)
    bv = jnp.zeros((2 * Cout,), jnp.float32)
    for bi, ((wf, bf), (wg, bg), k) in enumerate(zip(filt_params, gate_params, KERNEL_SET)):
        for j in range(k):
            r = (KMAX - k) + j      # branch k uses the LAST k positions of the KMAX window
            W = W.at[bi * Ck:(bi + 1) * Ck, r * Cin:(r + 1) * Cin].set(wf[:, :, 0, j])
            W = W.at[Cout + bi * Ck:Cout + (bi + 1) * Ck,
                     r * Cin:(r + 1) * Cin].set(wg[:, :, 0, j])
        bv = bv.at[bi * Ck:(bi + 1) * Ck].set(bf)
        bv = bv.at[Cout + bi * Ck:Cout + (bi + 1) * Ck].set(bg)
    return W.astype(jnp.bfloat16), bv.reshape(2 * Cout, 1).astype(jnp.float32)


# ------------------------------ tile selection ------------------------------
def _vmem_capacity_bytes():
    try:
        return int(pltpu.get_tpu_info().vmem_capacity_bytes)
    except Exception:
        return 64 << 20           # assume the smallest (v7x-like) VMEM if the query fails


def _pick_tile_m(M, T, Cin, T_out, Cout, vmem_cap):
    """Largest multiple-of-128 M-tile fitting a generation-aware VMEM budget (incl. f32
    temporaries), capped so large problems still get >= ~4 grid steps (2 TCs on v7x x
    pipeline double-buffering)."""
    budget = min(vmem_cap // 4, 24 << 20)
    per_lane = (2 * T * Cin * 2                 # x block, bf16, double-buffered
                + 2 * T_out * Cout * 2          # o block, bf16, double-buffered
                + 4 * 2 * Cout * 3              # f32 acc / f / g live temporaries
                + 2 * KMAX * Cin                # im2col window slice (bf16)
                + 4 * 2 * Cout)                 # hoisted bias broadcast (f32)
    tile = (budget // per_lane) // 128 * 128
    tile = max(128, min(2048, tile))
    m128 = -(-M // 128) * 128
    n128 = m128 // 128
    desired_tiles = 4 if n128 >= 4 else (2 if n128 >= 2 else 1)
    tile = min(tile, max(128, (m128 // desired_tiles) // 128 * 128))
    return min(tile, m128)


# --------------------------------- wrapper ----------------------------------
def tiem_conv_pallas(x_nchw, filt_params, gate_params, dilation=1, out_dtype=jnp.bfloat16):
    B, Cin, N, T = x_nchw.shape
    Ck = filt_params[0][0].shape[0]
    Cout = Ck * len(KERNEL_SET)
    T_out = T - dilation * (KMAX - 1)
    assert T_out > 0, "time axis too short for the largest dilated kernel"
    M = B * N

    w, b = _pack_params(filt_params, gate_params, Cin, Ck)

    vmem_cap = _vmem_capacity_bytes()
    tile_m = _pick_tile_m(M, T, Cin, T_out, Cout, vmem_cap)
    m_pad = -(-M // tile_m) * tile_m
    grid = (m_pad // tile_m,)

    # NCHW -> (T*Cin, M): time-major/channel-minor rows, M = B*N lane-dense, zero-padded.
    # (When chaining MTGNN layers, keep activations in this lane-dense layout between
    #  layers and only convert at model boundaries to avoid wrapper HBM round trips.)
    x = jnp.transpose(x_nchw, (3, 1, 0, 2)).reshape(T * Cin, M)
    x = jnp.pad(x, ((0, 0), (0, m_pad - M))).astype(jnp.bfloat16)

    out_bytes = jnp.dtype(out_dtype).itemsize
    cost = pl.CostEstimate(
        flops=2 * m_pad * T_out * (2 * Cout) * (KMAX * Cin),    # executed (zero-padded) MACs
        transcendentals=2 * m_pad * T_out * Cout,               # tanh + sigmoid
        bytes_accessed=(x.size * 2 + w.size * 2 + b.size * 4
                        + m_pad * T_out * Cout * out_bytes),
    )

    kernel = _make_tiem_conv_kernel(Cin, Cout, T_out, dilation, tile_m)
    out = pl.pallas_call(
        kernel,
        out_shape=jax.ShapeDtypeStruct((T_out, Cout, m_pad), out_dtype),
        grid=grid,
        in_specs=[
            pl.BlockSpec((T * Cin, tile_m), lambda i: (0, i)),        # M-tiled input
            pl.BlockSpec((2 * Cout, KMAX * Cin), lambda i: (0, 0)),   # small, resident
            pl.BlockSpec((2 * Cout, 1), lambda i: (0, 0)),
        ],
        out_specs=pl.BlockSpec((T_out, Cout, tile_m), lambda i: (0, 0, i)),
        compiler_params=pltpu.CompilerParams(
            dimension_semantics=("parallel",),                    # megacore: split M tiles
            vmem_limit_bytes=int(min(vmem_cap * 3 // 4, 96 << 20)),
        ),
        cost_estimate=cost,
    )(x, w, b)

    # (T_out, Cout, M) -> (B, Cout, N, T_out)  (PyTorch NCHW output layout)
    out = out[:, :, :M].reshape(T_out, Cout, B, N)
    return jnp.transpose(out, (2, 1, 3, 0))


# ---------------- pure-JAX reference (mirrors the PyTorch module) ----------------
def _dilated_inception_ref(x, params, dilation):
    outs = []
    for (w, b), k in zip(params, KERNEL_SET):
        y = lax.conv_general_dilated(
            x, w, window_strides=(1, 1), padding="VALID",
            rhs_dilation=(1, dilation),
            dimension_numbers=("NCHW", "OIHW", "NCHW"))
        outs.append(y + b.reshape(1, -1, 1, 1))
    T_out = outs[-1].shape[-1]
    outs = [o[..., -T_out:] for o in outs]
    return jnp.concatenate(outs, axis=1)


def tiem_conv_ref(x, filt_params, gate_params, dilation=1):
    f = jnp.tanh(_dilated_inception_ref(x, filt_params, dilation))
    g = jax.nn.sigmoid(_dilated_inception_ref(x, gate_params, dilation))
    return f * g


def _init_branch(key, cin, cout):
    """Deterministic synthetic params: list of (weight, bias) per kernel size."""
    ck = cout // len(KERNEL_SET)
    params = []
    for k in KERNEL_SET:
        key, kw, kb = jax.random.split(key, 3)
        w = 0.1 * jax.random.normal(kw, (ck, cin, 1, k), jnp.float32)  # torch OIHW
        b = 0.1 * jax.random.normal(kb, (ck,), jnp.float32)
        params.append((w, b))
    return key, params


if __name__ == "__main__":
    B, Cin, N, T = 2, 4, 16, 16     # (batch, in_channel, nodes, time)
    Cout = 8                        # out_channel (divisible by 4)
    dilation = 1                    # -> T_out = T - 6*dilation = 10

    key = jax.random.PRNGKey(0)
    key, xk = jax.random.split(key)
    x = jax.random.normal(xk, (B, Cin, N, T), jnp.float32)

    key, filt_params = _init_branch(key, Cin, Cout)
    key, gate_params = _init_branch(key, Cin, Cout)

    out = jax.block_until_ready(tiem_conv_pallas(x, filt_params, gate_params, dilation))
    ref = jax.block_until_ready(tiem_conv_ref(x, filt_params, gate_params, dilation))

    assert out.shape == (B, Cout, N, T - 6 * dilation), out.shape
    max_err = float(jnp.max(jnp.abs(out.astype(jnp.float32) - ref)))
    # bf16 matmul inputs AND bf16 output -> slightly looser tolerance than pure f32.
    assert jnp.allclose(out.astype(jnp.float32), ref, atol=3e-2, rtol=3e-2), max_err
    print("KERNEL_OK")
</pallas_src>

<mosaic_0001>
module attributes {stable_mosaic.version = 11 : i64} {
  func.func @kernel(%arg0: i32, %arg1: memref<64x128xbf16, #tpu.memory_space<vmem>>, %arg2: memref<16x28xbf16, #tpu.memory_space<vmem>>, %arg3: memref<16x1xf32, #tpu.memory_space<vmem>>, %arg4: memref<10x8x128xbf16, #tpu.memory_space<vmem>>) attributes {dimension_semantics = [#tpu.dimension_semantics<parallel>], iteration_bounds = array<i64: 1>, scalar_prefetch = 0 : i64, scratch_operands = 0 : i64, tpu.core_type = #tpu.core_type<tc>, window_params = [{transform_indices = @transform_0, window_bounds = array<i64: 64, 128>}, {pipeline_mode = #tpu.pipeline_mode<synchronous>, transform_indices = @transform_1, window_bounds = array<i64: 16, 28>}, {pipeline_mode = #tpu.pipeline_mode<synchronous>, transform_indices = @transform_2, window_bounds = array<i64: 16, 1>}, {transform_indices = @transform_3, window_bounds = array<i64: 10, 8, 128>}]} {
    %c0 = arith.constant 0 : index
    %c0_0 = arith.constant 0 : index
    %0 = vector.load %arg2[%c0, %c0_0] : memref<16x28xbf16, #tpu.memory_space<vmem>>, vector<16x28xbf16>
    %c0_1 = arith.constant 0 : index
    %c0_2 = arith.constant 0 : index
    %1 = vector.load %arg3[%c0_1, %c0_2] : memref<16x1xf32, #tpu.memory_space<vmem>>, vector<16x1xf32>
    %2 = vector.shape_cast %1 : vector<16x1xf32> to vector<16x1xf32>
    %3 = vector.broadcast %2 : vector<16x1xf32> to vector<16x128xf32>
    %c0_3 = arith.constant 0 : index
    %c0_4 = arith.constant 0 : index
    %4 = vector.load %arg1[%c0_3, %c0_4] : memref<64x128xbf16, #tpu.memory_space<vmem>>, vector<28x128xbf16>
    %cst = arith.constant dense<0.000000e+00> : vector<16x128xf32>
    %5 = tpu.matmul %0, %4, %cst {dimension_numbers = #tpu.dot_dimension_numbers<[1], [0], [0], [1], [0, 0, 1, 1], [], []>} : vector<16x28xbf16>, vector<28x128xbf16>, vector<16x128xf32> -> vector<16x128xf32>
    %6 = arith.addf %5, %3 : vector<16x128xf32>
    %7 = vector.extract_strided_slice %6 {offsets = [0, 0], sizes = [8, 128], strides = [1, 1]} : vector<16x128xf32> to vector<8x128xf32>
    %8 = math.tanh %7 : vector<8x128xf32>
    %9 = vector.extract_strided_slice %6 {offsets = [8, 0], sizes = [8, 128], strides = [1, 1]} : vector<16x128xf32> to vector<8x128xf32>
    %10 = arith.negf %9 : vector<8x128xf32>
    %11 = math.exp %10 : vector<8x128xf32>
    %cst_5 = arith.constant 1.000000e+00 : f32
    %12 = vector.broadcast %cst_5 : f32 to vector<8x128xf32>
    %13 = arith.addf %12, %11 : vector<8x128xf32>
    %14 = arith.divf %12, %13 : vector<8x128xf32>
    %15 = arith.mulf %8, %14 : vector<8x128xf32>
    %16 = arith.truncf %15 : vector<8x128xf32> to vector<8x128xbf16>
    %c0_6 = arith.constant 0 : index
    %c0_7 = arith.constant 0 : index
    %c0_8 = arith.constant 0 : index
    %17 = vector.load %arg4[%c0_6, %c0_7, %c0_8] : memref<10x8x128xbf16, #tpu.memory_space<vmem>>, vector<1x8x128xbf16>
    %18 = vector.shape_cast %17 : vector<1x8x128xbf16> to vector<8x128xbf16>
    %19 = vector.shape_cast %16 : vector<8x128xbf16> to vector<1x8x128xbf16>
    tpu.vector_store %arg4[%c0_6, %c0_7, %c0_8], %19 {strides = array<i32>} : memref<10x8x128xbf16, #tpu.memory_space<vmem>>, vector<1x8x128xbf16>,
    %c4 = arith.constant 4 : index
    %c0_9 = arith.constant 0 : index
    %20 = vector.load %arg1[%c4, %c0_9] : memref<64x128xbf16, #tpu.memory_space<vmem>>, vector<28x128xbf16>
    %cst_10 = arith.constant dense<0.000000e+00> : vector<16x128xf32>
    %21 = tpu.matmul %0, %20, %cst_10 {dimension_numbers = #tpu.dot_dimension_numbers<[1], [0], [0], [1], [0, 0, 1, 1], [], []>} : vector<16x28xbf16>, vector<28x128xbf16>, vector<16x128xf32> -> vector<16x128xf32>
    %22 = arith.addf %21, %3 : vector<16x128xf32>
    %23 = vector.extract_strided_slice %22 {offsets = [0, 0], sizes = [8, 128], strides = [1, 1]} : vector<16x128xf32> to vector<8x128xf32>
    %24 = math.tanh %23 : vector<8x128xf32>
    %25 = vector.extract_strided_slice %22 {offsets = [8, 0], sizes = [8, 128], strides = [1, 1]} : vector<16x128xf32> to vector<8x128xf32>
    %26 = arith.negf %25 : vector<8x128xf32>
    %27 = math.exp %26 : vector<8x128xf32>
    %cst_11 = arith.constant 1.000000e+00 : f32
    %28 = vector.broadcast %cst_11 : f32 to vector<8x128xf32>
    %29 = arith.addf %28, %27 : vector<8x128xf32>
    %30 = arith.divf %28, %29 : vector<8x128xf32>
    %31 = arith.mulf %24, %30 : vector<8x128xf32>
    %32 = arith.truncf %31 : vector<8x128xf32> to vector<8x128xbf16>
    %c1 = arith.constant 1 : index
    %c0_12 = arith.constant 0 : index
    %c0_13 = arith.constant 0 : index
    %33 = vector.load %arg4[%c1, %c0_12, %c0_13] : memref<10x8x128xbf16, #tpu.memory_space<vmem>>, vector<1x8x128xbf16>
    %34 = vector.shape_cast %33 : vector<1x8x128xbf16> to vector<8x128xbf16>
    %35 = vector.shape_cast %32 : vector<8x128xbf16> to vector<1x8x128xbf16>
    tpu.vector_store %arg4[%c1, %c0_12, %c0_13], %35 {strides = array<i32>} : memref<10x8x128xbf16, #tpu.memory_space<vmem>>, vector<1x8x128xbf16>,
    %c8 = arith.constant 8 : index
    %c0_14 = arith.constant 0 : index
    %36 = vector.load %arg1[%c8, %c0_14] : memref<64x128xbf16, #tpu.memory_space<vmem>>, vector<28x128xbf16>
    %cst_15 = arith.constant dense<0.000000e+00> : vector<16x128xf32>
    %37 = tpu.matmul %0, %36, %cst_15 {dimension_numbers = #tpu.dot_dimension_numbers<[1], [0], [0], [1], [0, 0, 1, 1], [], []>} : vector<16x28xbf16>, vector<28x128xbf16>, vector<16x128xf32> -> vector<16x128xf32>
    %38 = arith.addf %37, %3 : vector<16x128xf32>
    %39 = vector.extract_strided_slice %38 {offsets = [0, 0], sizes = [8, 128], strides = [1, 1]} : vector<16x128xf32> to vector<8x128xf32>
    %40 = math.tanh %39 : vector<8x128xf32>
    %41 = vector.extract_strided_slice %38 {offsets = [8, 0], sizes = [8, 128], strides = [1, 1]} : vector<16x128xf32> to vector<8x128xf32>
    %42 = arith.negf %41 : vector<8x128xf32>
    %43 = math.exp %42 : vector<8x128xf32>
    %cst_16 = arith.constant 1.000000e+00 : f32
    %44 = vector.broadcast %cst_16 : f32 to vector<8x128xf32>
    %45 = arith.addf %44, %43 : vector<8x128xf32>
    %46 = arith.divf %44, %45 : vector<8x128xf32>
    %47 = arith.mulf %40, %46 : vector<8x128xf32>
    %48 = arith.truncf %47 : vector<8x128xf32> to vector<8x128xbf16>
    %c2 = arith.constant 2 : index
    %c0_17 = arith.constant 0 : index
    %c0_18 = arith.constant 0 : index
    %49 = vector.load %arg4[%c2, %c0_17, %c0_18] : memref<10x8x128xbf16, #tpu.memory_space<vmem>>, vector<1x8x128xbf16>
    %50 = vector.shape_cast %49 : vector<1x8x128xbf16> to vector<8x128xbf16>
    %51 = vector.shape_cast %48 : vector<8x128xbf16> to vector<1x8x128xbf16>
    tpu.vector_store %arg4[%c2, %c0_17, %c0_18], %51 {strides = array<i32>} : memref<10x8x128xbf16, #tpu.memory_space<vmem>>, vector<1x8x128xbf16>,
    %c12 = arith.constant 12 : index
    %c0_19 = arith.constant 0 : index
    %52 = vector.load %arg1[%c12, %c0_19] : memref<64x128xbf16, #tpu.memory_space<vmem>>, vector<28x128xbf16>
    %cst_20 = arith.constant dense<0.000000e+00> : vector<16x128xf32>
    %53 = tpu.matmul %0, %52, %cst_20 {dimension_numbers = #tpu.dot_dimension_numbers<[1], [0], [0], [1], [0, 0, 1, 1], [], []>} : vector<16x28xbf16>, vector<28x128xbf16>, vector<16x128xf32> -> vector<16x128xf32>
    %54 = arith.addf %53, %3 : vector<16x128xf32>
    %55 = vector.extract_strided_slice %54 {offsets = [0, 0], sizes = [8, 128], strides = [1, 1]} : vector<16x128xf32> to vector<8x128xf32>
    %56 = math.tanh %55 : vector<8x128xf32>
    %57 = vector.extract_strided_slice %54 {offsets = [8, 0], sizes = [8, 128], strides = [1, 1]} : vector<16x128xf32> to vector<8x128xf32>
    %58 = arith.negf %57 : vector<8x128xf32>
    %59 = math.exp %58 : vector<8x128xf32>
    %cst_21 = arith.constant 1.000000e+00 : f32
    %60 = vector.broadcast %cst_21 : f32 to vector<8x128xf32>
    %61 = arith.addf %60, %59 : vector<8x128xf32>
    %62 = arith.divf %60, %61 : vector<8x128xf32>
    %63 = arith.mulf %56, %62 : vector<8x128xf32>
    %64 = arith.truncf %63 : vector<8x128xf32> to vector<8x128xbf16>
    %c3 = arith.constant 3 : index
    %c0_22 = arith.constant 0 : index
    %c0_23 = arith.constant 0 : index
    %65 = vector.load %arg4[%c3, %c0_22, %c0_23] : memref<10x8x128xbf16, #tpu.memory_space<vmem>>, vector<1x8x128xbf16>
    %66 = vector.shape_cast %65 : vector<1x8x128xbf16> to vector<8x128xbf16>
    %67 = vector.shape_cast %64 : vector<8x128xbf16> to vector<1x8x128xbf16>
    tpu.vector_store %arg4[%c3, %c0_22, %c0_23], %67 {strides = array<i32>} : memref<10x8x128xbf16, #tpu.memory_space<vmem>>, vector<1x8x128xbf16>,
    %c16 = arith.constant 16 : index
    %c0_24 = arith.constant 0 : index
    %68 = vector.load %arg1[%c16, %c0_24] : memref<64x128xbf16, #tpu.memory_space<vmem>>, vector<28x128xbf16>
    %cst_25 = arith.constant dense<0.000000e+00> : vector<16x128xf32>
    %69 = tpu.matmul %0, %68, %cst_25 {dimension_numbers = #tpu.dot_dimension_numbers<[1], [0], [0], [1], [0, 0, 1, 1], [], []>} : vector<16x28xbf16>, vector<28x128xbf16>, vector<16x128xf32> -> vector<16x128xf32>
    %70 = arith.addf %69, %3 : vector<16x128xf32>
    %71 = vector.extract_strided_slice %70 {offsets = [0, 0], sizes = [8, 128], strides = [1, 1]} : vector<16x128xf32> to vector<8x128xf32>
    %72 = math.tanh %71 : vector<8x128xf32>
    %73 = vector.extract_strided_slice %70 {offsets = [8, 0], sizes = [8, 128], strides = [1, 1]} : vector<16x128xf32> to vector<8x128xf32>
    %74 = arith.negf %73 : vector<8x128xf32>
    %75 = math.exp %74 : vector<8x128xf32>
    %cst_26 = arith.constant 1.000000e+00 : f32
    %76 = vector.broadcast %cst_26 : f32 to vector<8x128xf32>
    %77 = arith.addf %76, %75 : vector<8x128xf32>
    %78 = arith.divf %76, %77 : vector<8x128xf32>
    %79 = arith.mulf %72, %78 : vector<8x128xf32>
    %80 = arith.truncf %79 : vector<8x128xf32> to vector<8x128xbf16>
    %c4_27 = arith.constant 4 : index
    %c0_28 = arith.constant 0 : index
    %c0_29 = arith.constant 0 : index
    %81 = vector.load %arg4[%c4_27, %c0_28, %c0_29] : memref<10x8x128xbf16, #tpu.memory_space<vmem>>, vector<1x8x128xbf16>
    %82 = vector.shape_cast %81 : vector<1x8x128xbf16> to vector<8x128xbf16>
    %83 = vector.shape_cast %80 : vector<8x128xbf16> to vector<1x8x128xbf16>
    tpu.vector_store %arg4[%c4_27, %c0_28, %c0_29], %83 {strides = array<i32>} : memref<10x8x128xbf16, #tpu.memory_space<vmem>>, vector<1x8x128xbf16>,
    %c20 = arith.constant 20 : index
    %c0_30 = arith.constant 0 : index
    %84 = vector.load %arg1[%c20, %c0_30] : memref<64x128xbf16, #tpu.memory_space<vmem>>, vector<28x128xbf16>
    %cst_31 = arith.constant dense<0.000000e+00> : vector<16x128xf32>
    %85 = tpu.matmul %0, %84, %cst_31 {dimension_numbers = #tpu.dot_dimension_numbers<[1], [0], [0], [1], [0, 0, 1, 1], [], []>} : vector<16x28xbf16>, vector<28x128xbf16>, vector<16x128xf32> -> vector<16x128xf32>
    %86 = arith.addf %85, %3 : vector<16x128xf32>
    %87 = vector.extract_strided_slice %86 {offsets = [0, 0], sizes = [8, 128], strides = [1, 1]} : vector<16x128xf32> to vector<8x128xf32>
    %88 = math.tanh %87 : vector<8x128xf32>
    %89 = vector.extract_strided_slice %86 {offsets = [8, 0], sizes = [8, 128], strides = [1, 1]} : vector<16x128xf32> to vector<8x128xf32>
    %90 = arith.negf %89 : vector<8x128xf32>
    %91 = math.exp %90 : vector<8x128xf32>
    %cst_32 = arith.constant 1.000000e+00 : f32
    %92 = vector.broadcast %cst_32 : f32 to vector<8x128xf32>
    %93 = arith.addf %92, %91 : vector<8x128xf32>
    %94 = arith.divf %92, %93 : vector<8x128xf32>
    %95 = arith.mulf %88, %94 : vector<8x128xf32>
    %96 = arith.truncf %95 : vector<8x128xf32> to vector<8x128xbf16>
    %c5 = arith.constant 5 : index
    %c0_33 = arith.constant 0 : index
    %c0_34 = arith.constant 0 : index
    %97 = vector.load %arg4[%c5, %c0_33, %c0_34] : memref<10x8x128xbf16, #tpu.memory_space<vmem>>, vector<1x8x128xbf16>
    %98 = vector.shape_cast %97 : vector<1x8x128xbf16> to vector<8x128xbf16>
    %99 = vector.shape_cast %96 : vector<8x128xbf16> to vector<1x8x128xbf16>
    tpu.vector_store %arg4[%c5, %c0_33, %c0_34], %99 {strides = array<i32>} : memref<10x8x128xbf16, #tpu.memory_space<vmem>>, vector<1x8x128xbf16>,
    %c24 = arith.constant 24 : index
    %c0_35 = arith.constant 0 : index
    %100 = vector.load %arg1[%c24, %c0_35] : memref<64x128xbf16, #tpu.memory_space<vmem>>, vector<28x128xbf16>
    %cst_36 = arith.constant dense<0.000000e+00> : vector<16x128xf32>
    %101 = tpu.matmul %0, %100, %cst_36 {dimension_numbers = #tpu.dot_dimension_numbers<[1], [0], [0], [1], [0, 0, 1, 1], [], []>} : vector<16x28xbf16>, vector<28x128xbf16>, vector<16x128xf32> -> vector<16x128xf32>
    %102 = arith.addf %101, %3 : vector<16x128xf32>
    %103 = vector.extract_strided_slice %102 {offsets = [0, 0], sizes = [8, 128], strides = [1, 1]} : vector<16x128xf32> to vector<8x128xf32>
    %104 = math.tanh %103 : vector<8x128xf32>
    %105 = vector.extract_strided_slice %102 {offsets = [8, 0], sizes = [8, 128], strides = [1, 1]} : vector<16x128xf32> to vector<8x128xf32>
    %106 = arith.negf %105 : vector<8x128xf32>
    %107 = math.exp %106 : vector<8x128xf32>
    %cst_37 = arith.constant 1.000000e+00 : f32
    %108 = vector.broadcast %cst_37 : f32 to vector<8x128xf32>
    %109 = arith.addf %108, %107 : vector<8x128xf32>
    %110 = arith.divf %108, %109 : vector<8x128xf32>
    %111 = arith.mulf %104, %110 : vector<8x128xf32>
    %112 = arith.truncf %111 : vector<8x128xf32> to vector<8x128xbf16>
    %c6 = arith.constant 6 : index
    %c0_38 = arith.constant 0 : index
    %c0_39 = arith.constant 0 : index
    %113 = vector.load %arg4[%c6, %c0_38, %c0_39] : memref<10x8x128xbf16, #tpu.memory_space<vmem>>, vector<1x8x128xbf16>
    %114 = vector.shape_cast %113 : vector<1x8x128xbf16> to vector<8x128xbf16>
    %115 = vector.shape_cast %112 : vector<8x128xbf16> to vector<1x8x128xbf16>
    tpu.vector_store %arg4[%c6, %c0_38, %c0_39], %115 {strides = array<i32>} : memref<10x8x128xbf16, #tpu.memory_space<vmem>>, vector<1x8x128xbf16>,
    %c28 = arith.constant 28 : index
    %c0_40 = arith.constant 0 : index
    %116 = vector.load %arg1[%c28, %c0_40] : memref<64x128xbf16, #tpu.memory_space<vmem>>, vector<28x128xbf16>
    %cst_41 = arith.constant dense<0.000000e+00> : vector<16x128xf32>
    %117 = tpu.matmul %0, %116, %cst_41 {dimension_numbers = #tpu.dot_dimension_numbers<[1], [0], [0], [1], [0, 0, 1, 1], [], []>} : vector<16x28xbf16>, vector<28x128xbf16>, vector<16x128xf32> -> vector<16x128xf32>
    %118 = arith.addf %117, %3 : vector<16x128xf32>
    %119 = vector.extract_strided_slice %118 {offsets = [0, 0], sizes = [8, 128], strides = [1, 1]} : vector<16x128xf32> to vector<8x128xf32>
    %120 = math.tanh %119 : vector<8x128xf32>
    %121 = vector.extract_strided_slice %118 {offsets = [8, 0], sizes = [8, 128], strides = [1, 1]} : vector<16x128xf32> to vector<8x128xf32>
    %122 = arith.negf %121 : vector<8x128xf32>
    %123 = math.exp %122 : vector<8x128xf32>
    %cst_42 = arith.constant 1.000000e+00 : f32
    %124 = vector.broadcast %cst_42 : f32 to vector<8x128xf32>
    %125 = arith.addf %124, %123 : vector<8x128xf32>
    %126 = arith.divf %124, %125 : vector<8x128xf32>
    %127 = arith.mulf %120, %126 : vector<8x128xf32>
    %128 = arith.truncf %127 : vector<8x128xf32> to vector<8x128xbf16>
    %c7 = arith.constant 7 : index
    %c0_43 = arith.constant 0 : index
    %c0_44 = arith.constant 0 : index
    %129 = vector.load %arg4[%c7, %c0_43, %c0_44] : memref<10x8x128xbf16, #tpu.memory_space<vmem>>, vector<1x8x128xbf16>
    %130 = vector.shape_cast %129 : vector<1x8x128xbf16> to vector<8x128xbf16>
    %131 = vector.shape_cast %128 : vector<8x128xbf16> to vector<1x8x128xbf16>
    tpu.vector_store %arg4[%c7, %c0_43, %c0_44], %131 {strides = array<i32>} : memref<10x8x128xbf16, #tpu.memory_space<vmem>>, vector<1x8x128xbf16>,
    %c32 = arith.constant 32 : index
    %c0_45 = arith.constant 0 : index
    %132 = vector.load %arg1[%c32, %c0_45] : memref<64x128xbf16, #tpu.memory_space<vmem>>, vector<28x128xbf16>
    %cst_46 = arith.constant dense<0.000000e+00> : vector<16x128xf32>
    %133 = tpu.matmul %0, %132, %cst_46 {dimension_numbers = #tpu.dot_dimension_numbers<[1], [0], [0], [1], [0, 0, 1, 1], [], []>} : vector<16x28xbf16>, vector<28x128xbf16>, vector<16x128xf32> -> vector<16x128xf32>
    %134 = arith.addf %133, %3 : vector<16x128xf32>
    %135 = vector.extract_strided_slice %134 {offsets = [0, 0], sizes = [8, 128], strides = [1, 1]} : vector<16x128xf32> to vector<8x128xf32>
    %136 = math.tanh %135 : vector<8x128xf32>
    %137 = vector.extract_strided_slice %134 {offsets = [8, 0], sizes = [8, 128], strides = [1, 1]} : vector<16x128xf32> to vector<8x128xf32>
    %138 = arith.negf %137 : vector<8x128xf32>
    %139 = math.exp %138 : vector<8x128xf32>
    %cst_47 = arith.constant 1.000000e+00 : f32
    %140 = vector.broadcast %cst_47 : f32 to vector<8x128xf32>
    %141 = arith.addf %140, %139 : vector<8x128xf32>
    %142 = arith.divf %140, %141 : vector<8x128xf32>
    %143 = arith.mulf %136, %142 : vector<8x128xf32>
    %144 = arith.truncf %143 : vector<8x128xf32> to vector<8x128xbf16>
    %c8_48 = arith.constant 8 : index
    %c0_49 = arith.constant 0 : index
    %c0_50 = arith.constant 0 : index
    %145 = vector.load %arg4[%c8_48, %c0_49, %c0_50] : memref<10x8x128xbf16, #tpu.memory_space<vmem>>, vector<1x8x128xbf16>
    %146 = vector.shape_cast %145 : vector<1x8x128xbf16> to vector<8x128xbf16>
    %147 = vector.shape_cast %144 : vector<8x128xbf16> to vector<1x8x128xbf16>
    tpu.vector_store %arg4[%c8_48, %c0_49, %c0_50], %147 {strides = array<i32>} : memref<10x8x128xbf16, #tpu.memory_space<vmem>>, vector<1x8x128xbf16>,
    %c36 = arith.constant 36 : index
    %c0_51 = arith.constant 0 : index
    %148 = vector.load %arg1[%c36, %c0_51] : memref<64x128xbf16, #tpu.memory_space<vmem>>, vector<28x128xbf16>
    %cst_52 = arith.constant dense<0.000000e+00> : vector<16x128xf32>
    %149 = tpu.matmul %0, %148, %cst_52 {dimension_numbers = #tpu.dot_dimension_numbers<[1], [0], [0], [1], [0, 0, 1, 1], [], []>} : vector<16x28xbf16>, vector<28x128xbf16>, vector<16x128xf32> -> vector<16x128xf32>
    %150 = arith.addf %149, %3 : vector<16x128xf32>
    %151 = vector.extract_strided_slice %150 {offsets = [0, 0], sizes = [8, 128], strides = [1, 1]} : vector<16x128xf32> to vector<8x128xf32>
    %152 = math.tanh %151 : vector<8x128xf32>
    %153 = vector.extract_strided_slice %150 {offsets = [8, 0], sizes = [8, 128], strides = [1, 1]} : vector<16x128xf32> to vector<8x128xf32>
    %154 = arith.negf %153 : vector<8x128xf32>
    %155 = math.exp %154 : vector<8x128xf32>
    %cst_53 = arith.constant 1.000000e+00 : f32
    %156 = vector.broadcast %cst_53 : f32 to vector<8x128xf32>
    %157 = arith.addf %156, %155 : vector<8x128xf32>
    %158 = arith.divf %156, %157 : vector<8x128xf32>
    %159 = arith.mulf %152, %158 : vector<8x128xf32>
    %160 = arith.truncf %159 : vector<8x128xf32> to vector<8x128xbf16>
    %c9 = arith.constant 9 : index
    %c0_54 = arith.constant 0 : index
    %c0_55 = arith.constant 0 : index
    %161 = vector.load %arg4[%c9, %c0_54, %c0_55] : memref<10x8x128xbf16, #tpu.memory_space<vmem>>, vector<1x8x128xbf16>
    %162 = vector.shape_cast %161 : vector<1x8x128xbf16> to vector<8x128xbf16>
    %163 = vector.shape_cast %160 : vector<8x128xbf16> to vector<1x8x128xbf16>
    tpu.vector_store %arg4[%c9, %c0_54, %c0_55], %163 {strides = array<i32>} : memref<10x8x128xbf16, #tpu.memory_space<vmem>>, vector<1x8x128xbf16>,
    return
  }
  func.func @transform_0(%arg0: i32) -> (i32, i32) {
    %c0_i32 = arith.constant 0 : i32
    %c0_i32_0 = arith.constant 0 : i32
    return %c0_i32, %arg0 : i32, i32
  }
  func.func @transform_1(%arg0: i32) -> (i32, i32) {
    %c0_i32 = arith.constant 0 : i32
    %c0_i32_0 = arith.constant 0 : i32
    %c0_i32_1 = arith.constant 0 : i32
    return %c0_i32, %c0_i32_0 : i32, i32
  }
  func.func @transform_2(%arg0: i32) -> (i32, i32) {
    %c0_i32 = arith.constant 0 : i32
    %c0_i32_0 = arith.constant 0 : i32
    %c0_i32_1 = arith.constant 0 : i32
    return %c0_i32, %c0_i32_0 : i32, i32
  }
  func.func @transform_3(%arg0: i32) -> (i32, i32, i32) {
    %c0_i32 = arith.constant 0 : i32
    %c0_i32_0 = arith.constant 0 : i32
    %c0_i32_1 = arith.constant 0 : i32
    return %c0_i32, %c0_i32_0, %arg0 : i32, i32, i32
  }
}

</mosaic_0001>

<bundles_post_ra>
// kernel: tpu_custom_call.1
= control target key start
LH: loop header
LB: loop body
LE: loop exit
PB: predicated region body
PF: predicated region fallthrough
CT: control target
= control target key end

     0   :  { %8 = vsyncpa [#allocation3], 0  ;;  %s1105_s0 = inlined_call_operand.hbm [shape: bf16[64,128], index: 0, kind: input, shape index: {}]   ;;  %s1106_s1 = inlined_call_operand.vmem [shape: bf16[16,28], index: 1, kind: input, shape index: {}]   ;;  %s1107_s2 = inlined_call_operand.vmem [shape: f32[16,1], index: 2, kind: input, shape index: {}]   ;;  %s1108_s3 = inlined_call_operand.hbm [shape: bf16[10,8,128], index: 3, kind: output, shape index: {}]  }
   0x1   :  { %9 = vsyncpa [#allocation4], 0  ;;  %s14_s14 = sshll.u32 %s1105_s0, 4  ;;  %s893_s15 = smov [#allocation2]   ;;  %s15_s14 = int_to_ptr.hbm [resolvable:$true] %s14_s14 }
   0x2   :  { %s16_s16 = sshll.u32 %s893_s15, 4  ;;  %s894_s17 = smov 64   ;;  %s17_s16 = int_to_ptr.vmem [resolvable:$true] %s16_s16 }
   0x3   :  { %s895_s18 = smov 4  }
   0x4   :  { %22 = dma.hbm_to_vmem [thread:$0]  %s15_s14, 512, %s17_s16, [#allocation3], %s894_s17, %s894_s17, %s895_s18  }
   0x5   :  { %889 = dma.done.wait [#allocation3], 512  }
   0x6   :  { %890 = vsyncadd [#allocation3], 4294966784  ;;  %v896_v0 = vmov 0   ;;  %vm70_vm0 = vcmask 1045504   ;;  %v660_v1 = vld [vmem:[#allocation2 + $0x8] sm:$0xf] }
   0x7   :  { %780 = vset.pattern.permute.xlu0 %v896_v0  ;;  %v756_v2 = vld [vmem:[#allocation2 + $0x8] sm:$0x30]  ;;  %v760_v5 = vld [vmem:[#allocation2 + $0xc] sm:$0x30]  ;;  %v755_v9 = vld [vmem:[#allocation2] sm:$0xff]  ;;  %vm66_vm1 = vcmask 228352  }
   0x8   :  { %v680_v3 = vld [vmem:[#allocation2 + $0xc] sm:$0xf]  ;;  %v661_v4 = vor.u32 %v756_v2, %v660_v1  ;;  %v666_v10 = vld [vmem:[#allocation2] sm:$0xc]  ;;  %v759_v14 = vld [vmem:[#allocation2 + $0x4] sm:$0xff]  ;;  %s637_s26 = sshll.u32 %s1108_s3, 4  ;;  %s638_s26 = int_to_ptr.hbm [resolvable:$true] %s637_s26 }
   0x9   :  { %v758_v6 = vld [vmem:[#allocation2 + $0x8] sm:$0xff]  ;;  %v681_v8 = vor.u32 %v760_v5, %v680_v3  ;;  %v757_v15 = vld [vmem:[#allocation2] sm:$0xf0]  ;;  %v766_v20 = vld [vmem:[#allocation2 + $0x10] sm:$0xff] }
   0xa   :  { %v762_v7 = vld [vmem:[#allocation2 + $0xc] sm:$0xff]  ;;  %v72_v11 = vsel %vm70_vm0, %v661_v4, 0  ;;  %v127_v12 = vrot.slane %v758_v6, 2  ;;  %v667_v17 = vor.u32 %v757_v15, %v666_v10  ;;  %v686_v18 = vld [vmem:[#allocation2 + $0x4] sm:$0xc]  ;;  %v357_v29 = vrot.slane %v766_v20, 2 }
   0xb   :  { %v242_v13 = vrot.slane %v762_v7, 2  ;;  %80 = vmatpush.bf16.msra.mxu0 %v72_v11  ;;  %v187_v16 = vsel %vm70_vm0, %v681_v8, 0  ;;  %v761_v19 = vld [vmem:[#allocation2 + $0x4] sm:$0xf0]  ;;  %v700_v24 = vld [vmem:[#allocation2 + $0x10] sm:$0xf] }
   0xc   :  { %195 = vmatpush.bf16.msra.mxu2 %v187_v16  ;;  %v131_v21 = vsel %vm70_vm0, %v127_v12, 0  ;;  %v687_v23 = vor.u32 %v761_v19, %v686_v18  ;;  %v764_v25 = vld [vmem:[#allocation2 + $0x10] sm:$0x30]  ;;  %v126_v26 = vrot.slane %v667_v17, 2  ;;  %v931_v27 = vld [vmem:[%s1106_s1] sm:$0xff]  ;;  %v35_v30 = vld [vmem:[%s1107_s2 + $0x8] sm:$0xff] }
   0xd   :  { %v246_v22 = vsel %vm70_vm0, %v242_v13, 0  ;;  %139 = vmatpush.bf16.msra.mxu1 %v131_v21  ;;  %v701_v28 = vor.u32 %v764_v25, %v700_v24  ;;  %v720_v31 = vld [vmem:[#allocation2 + $0x14] sm:$0xf]  ;;  %43 = vperm.xlu0 %780, %v35_v30   ;;  %v768_v33 = vld [vmem:[#allocation2 + $0x14] sm:$0x30]  ;;  %v361_v38 = vsel %vm70_vm0, %v357_v29, 0 }
   0xe   :  { %254 = vmatpush.bf16.msra.mxu3 %v246_v22  ;;  %v241_v32 = vrot.slane %v687_v23, 2  ;;  %v706_v34 = vld [vmem:[#allocation2 + $0x8] sm:$0xc]  ;;  %v770_v35 = vld [vmem:[#allocation2 + $0x14] sm:$0xff]  ;;  %v128_v36 = vsel %vm70_vm0, %v126_v26, %v127_v12  ;;  %v721_v39 = vor.u32 %v768_v33, %v720_v31  ;;  %v765_v40 = vld [vmem:[#allocation2 + $0x8] sm:$0xf0] }
   0xf   :  { %81 = vmatpush.bf16.msra.mxu0 %v755_v9  ;;  %v302_v37 = vsel %vm70_vm0, %v701_v28, 0  ;;  %v707_v42 = vor.u32 %v765_v40, %v706_v34  ;;  %v472_v43 = vrot.slane %v770_v35, 2  ;;  %v726_v44 = vld [vmem:[#allocation2 + $0xc] sm:$0xc]  ;;  %v769_v45 = vld [vmem:[#allocation2 + $0xc] sm:$0xf0] }
  0x10   :  { %196 = vmatpush.bf16.msra.mxu2 %v759_v14  ;;  %v243_v41 = vsel %vm70_vm0, %v241_v32, %v242_v13  ;;  %v774_v46 = vld [vmem:[#allocation2 + $0x18] sm:$0xff]  ;;  %v417_v47 = vsel %vm70_vm0, %v721_v39, 0  ;;  %v763_v48 = vld [vmem:[#allocation2 + $0x8] sm:$0xff]  ;;  %v727_v49 = vor.u32 %v769_v45, %v726_v44  ;;  %v746_v56 = vld [vmem:[#allocation2 + $0x10] sm:$0xc] }
  0x11   :  { %140 = vmatpush.bf16.msra.mxu1 %v128_v36  ;;  %v740_v50 = vld [vmem:[#allocation2 + $0x18] sm:$0xf]  ;;  %v772_v51 = vld [vmem:[#allocation2 + $0x18] sm:$0x30]  ;;  %v356_v52 = vrot.slane %v707_v42, 2  ;;  %v476_v53 = vsel %vm70_vm0, %v472_v43, 0 }
  0x12   :  { %255 = vmatpush.bf16.msra.mxu3 %v243_v41  ;;  %662 = vmatmul.msk.bf16.vlgmr.msra.gmra.mxu0 %vm66_vm1, %v931_v27  ;;  %v741_v54 = vor.u32 %v772_v51, %v740_v50  ;;  %v587_v55 = vrot.slane %v774_v46, 2  ;;  %v34_v57 = vld [vmem:[%s1107_s2] sm:$0xff]  ;;  %v471_v58 = vrot.slane %v727_v49, 2  ;;  %v773_v59 = vld [vmem:[#allocation2 + $0x10] sm:$0xf0]  ;;  %v767_v63 = vld [vmem:[#allocation2 + $0xc] sm:$0xff] }
  0x13   :  { %310 = vmatpush.bf16.msrb.mxu0 %v302_v37  ;;  %682 = vmatmul.msk.bf16.vlgmr.msra.gmra.mxu2 %vm66_vm1, %v931_v27  ;;  %v358_v60 = vsel %vm70_vm0, %v356_v52, %v357_v29  ;;  %v747_v62 = vor.u32 %v773_v59, %v746_v56  ;;  %v771_v3 = vld [vmem:[#allocation2 + $0x10] sm:$0xff]  ;;  %s897_s2 = smov [#allocation5]  }
  0x14   :  { %672 = vmatmul.msk.bf16.vlgmr.msra.gmra.mxu1 %vm66_vm1, %v931_v27  ;;  %v532_v61 = vsel %vm70_vm0, %v741_v54, 0  ;;  %425 = vmatpush.bf16.msrb.mxu2 %v417_v47  ;;  %v473_v0 = vsel %vm70_vm0, %v471_v58, %v472_v43  ;;  %v591_v1 = vsel %vm70_vm0, %v587_v55, 0  ;;  %s635_s23 = sshll.u32 %s897_s2, 4  ;;  %s636_s23 = int_to_ptr.vmem [resolvable:$true] %s635_s23 }
  0x15   :  { %369 = vmatpush.bf16.msrb.mxu1 %v361_v38  ;;  %692 = vmatmul.msk.bf16.vlgmr.msra.gmra.mxu3 %vm66_vm1, %v931_v27  ;;  %v586_v2 = vrot.slane %v747_v62, 2 }
  0x16   :  { %484 = vmatpush.bf16.msrb.mxu3 %v476_v53  ;;  %38 = vperm.xlu0 %780, %v34_v57  }
  0x17   :  { %311 = vmatpush.bf16.msrb.mxu0 %v763_v48  ;;  %v588_v4 = vsel %vm70_vm0, %v586_v2, %v587_v55 }
  0x18   :  { %426 = vmatpush.bf16.msrb.mxu2 %v767_v63 }
  0x19   :  { %370 = vmatpush.bf16.msrb.mxu1 %v358_v60 }
  0x1a   :  { %485 = vmatpush.bf16.msrb.mxu3 %v473_v0 }
  0x1b   :  { %540 = vmatpush.bf16.msra.mxu0 %v532_v61 }
  0x1d   :  { %599 = vmatpush.bf16.msra.mxu1 %v591_v1 }
  0x1f   :  { %541 = vmatpush.bf16.msra.mxu0 %v771_v3 }
  0x21   :  { %600 = vmatpush.bf16.msra.mxu1 %v588_v4 }
  0x22   :  { %702 = vmatmul.msk.bf16.vlgmr.msrb.gmra.mxu0 %vm66_vm1, %v931_v27 }
  0x23   :  { %722 = vmatmul.msk.bf16.vlgmr.msrb.gmra.mxu2 %vm66_vm1, %v931_v27 }
  0x24   :  { %712 = vmatmul.msk.bf16.vlgmr.msrb.gmra.mxu1 %vm66_vm1, %v931_v27 }
  0x25   :  { %732 = vmatmul.msk.bf16.vlgmr.msrb.gmra.mxu3 %vm66_vm1, %v931_v27 }
  0x32   :  { %742 = vmatmul.msk.bf16.vlgmr.msra.gmra.mxu0 %vm66_vm1, %v931_v27 }
  0x34   :  { %752 = vmatmul.msk.bf16.vlgmr.msra.gmra.mxu1 %vm66_vm1, %v931_v27 }
  0x7f   :  { %v970_v7 = vpop.permute.xlu0 %43 }
  0x88   :  { %v974_v16 = vpop.permute.xlu0 %38 }
  0x8f   :  { %v83_v5 = vpop.f32.mrf.mxu0 }
  0x90   :  { %v84_v25 = vadd.f32 %v83_v5, %v974_v16 }
  0x91   :  { %v142_v6 = vpop.f32.mrf.mxu1 }
  0x92   :  { %v143_v27 = vadd.f32 %v142_v6, %v974_v16 }
  0x96   :  { %v198_v8 = vpop.f32.mrf.mxu2 }
  0x97   :  { %v85_v9 = vpop.f32.mrf.mxu0  ;;  %v199_v30 = vadd.f32 %v198_v8, %v974_v16 }
  0x98   :  { %v257_v10 = vpop.f32.mrf.mxu3  ;;  %v86_v11 = vadd.f32 %v85_v9, %v970_v7 }
  0x99   :  { %v144_v12 = vpop.f32.mrf.mxu1  ;;  %v258_v31 = vadd.f32 %v257_v10, %v974_v16 }
  0x9a   :  { %v663_v13 = vmul.f32 -1.442695, %v86_v11  ;;  %v145_v14 = vadd.f32 %v144_v12, %v970_v7 }
  0x9c   :  { %781 = vpow2.f32 %v663_v13  ;;  %v673_v15 = vmul.f32 -1.442695, %v145_v14 }
  0x9e   :  { %783 = vpow2.f32 %v673_v15  ;;  %v200_v17 = vpop.f32.mrf.mxu2 }
  0x9f   :  { %v201_v18 = vadd.f32 %v200_v17, %v970_v7  ;;  %v313_v20 = vpop.f32.mrf.mxu0 }
  0xa0   :  { %v259_v19 = vpop.f32.mrf.mxu3  ;;  %v1008_v52 = vadd.f32 %v313_v20, %v974_v16 }
  0xa1   :  { %v260_v21 = vadd.f32 %v259_v19, %v970_v7  ;;  %v683_v22 = vmul.f32 -1.442695, %v201_v18  ;;  %v978_v23 = vpop.f32.mrf.mxu1 }
  0xa2   :  { %v782_v24 = vpop.eup %781 }
  0xa3   :  { %v693_v26 = vmul.f32 -1.442695, %v260_v21  ;;  %v982_v28 = vadd.f32 1.0, %v782_v24  ;;  %785 = vpow2.f32 %v683_v22 }
  0xa4   :  { %v784_v29 = vpop.eup %783 }
  0xa5   :  { %787 = vpow2.f32 %v693_v26  ;;  %v987_v32 = vadd.f32 1.0, %v784_v29  ;;  %v102_v40 = vand.u32 2147483647, %v982_v28  ;;  %v104_v43 = vand.u32 2147483648, %v982_v28 }
  0xa6   :  { %789 = vrcp.f32 %v982_v28  ;;  %v989_v33 = vpop.f32.mrf.mxu2  ;;  %vm98_vm2 = vweird.f32 %v982_v28 }
  0xa7   :  { %791 = vtanh.f32 %v84_v25  ;;  %v315_v34 = vpop.f32.mrf.mxu0  ;;  %v161_v44 = vand.u32 2147483647, %v987_v32  ;;  %v163_v49 = vand.u32 2147483648, %v987_v32  ;;  %vm1011_vm3 = vcmp.eq.f32.partialorder %v102_v40, 8.507059e+37 }
  0xa8   :  { %793 = vtanh.f32 %v143_v27  ;;  %v991_v35 = vpop.f32.mrf.mxu3  ;;  %v316_v37 = vadd.f32 %v315_v34, %v970_v7  ;;  %v105_v58 = vor.u32 1.1754944e-38, %v104_v43  ;;  %vm157_vm4 = vweird.f32 %v987_v32 }
  0xa9   :  { %795 = vrcp.f32 %v987_v32  ;;  %v786_v36 = vpop.eup %785  ;;  %v374_v38 = vpop.f32.mrf.mxu1  ;;  %vm1019_vm5 = vcmp.eq.f32.partialorder %v161_v44, 8.507059e+37  ;;  %v164_v0 = vor.u32 1.1754944e-38, %v163_v49 }
  0xaa   :  { %797 = vtanh.f32 %v199_v30  ;;  %v996_v41 = vadd.f32 1.0, %v786_v36  ;;  %v703_v46 = vmul.f32 -1.442695, %v316_v37  ;;  %v375_v50 = vadd.f32 %v374_v38, %v970_v7 }
  0xab   :  { %v788_v39 = vpop.eup %787  ;;  %799 = vtanh.f32 %v258_v31 }
  0xac   :  { %v790_v42 = vpop.eup %789  ;;  %v1000_v45 = vadd.f32 1.0, %v788_v39  ;;  %801 = vrcp.f32 %v996_v41  ;;  %v713_v1 = vmul.f32 -1.442695, %v375_v50  ;;  %vm213_vm7 = vweird.f32 %v996_v41 }
  0xad   :  { %v792_v47 = vpop.eup %791  ;;  %v94_v48 = vmul.f32 %v790_v42, %v982_v28  ;;  %vm99_vm6 = vweird.f32 %v790_v42  ;;  %v217_v4 = vand.u32 2147483647, %v996_v41  ;;  %v219_v9 = vand.u32 2147483648, %v996_v41 }
  0xae   :  { %v794_v51 = vpop.eup %793  ;;  %803 = vrcp.f32 %v1000_v45  ;;  %v430_v56 = vpop.f32.mrf.mxu2  ;;  %vm100_vm8 = vmor %vm98_vm2, %vm99_vm6  ;;  %v276_v19 = vand.u32 2147483647, %v1000_v45  ;;  %v278_v20 = vand.u32 2147483648, %v1000_v45  ;;  %vm272_vm13 = vweird.f32 %v1000_v45 }
  0xaf   :  { %v796_v53 = vpop.eup %795  ;;  %v95_v54 = vsub.f32 1.0, %v94_v48  ;;  %805 = vpow2.f32 %v703_v46  ;;  %v1025_v2 = vpop.f32.mrf.mxu0  ;;  %v431_v5 = vadd.f32 %v430_v56, %v970_v7  ;;  %vm218_vm15 = vcmp.eq.f32.partialorder %v217_v4, 8.507059e+37 }
  0xb0   :  { %v1015_v57 = vpop.eup %797  ;;  %v153_v59 = vmul.f32 %v796_v53, %v987_v32  ;;  %v489_v61 = vpop.f32.mrf.mxu3  ;;  %807 = vpow2.f32 %v713_v1  ;;  %vm158_vm9 = vweird.f32 %v796_v53  ;;  %v279_v48 = vor.u32 1.1754944e-38, %v278_v20 }
  0xb1   :  { %v1023_v62 = vpop.eup %799  ;;  %v96_v63 = vmul.f32 %v790_v42, %v95_v54  ;;  %v490_v10 = vadd.f32 %v489_v61, %v970_v7  ;;  %v723_v14 = vmul.f32 -1.442695, %v431_v5  ;;  %v1038_v21 = vpop.f32.mrf.mxu1  ;;  %vm159_vm10 = vmor %vm157_vm4, %vm158_vm9  ;;  %vm277_vm1 = vcmp.eq.f32.partialorder %v276_v19, 8.507059e+37 }
  0xb2   :  { %v154_v3 = vsub.f32 1.0, %v153_v59  ;;  %v802_v6 = vpop.eup %801  ;;  %v429_v59 = vadd.f32 %v989_v33, %v974_v16 }
  0xb3   :  { %v97_v8 = vadd.f32 %v790_v42, %v96_v63  ;;  %v209_v13 = vmul.f32 %v802_v6, %v996_v41  ;;  %809 = vpow2.f32 %v723_v14  ;;  %v733_v29 = vmul.f32 -1.442695, %v490_v10 }
  0xb4   :  { %v804_v11 = vpop.eup %803  ;;  %v155_v12 = vmul.f32 %v796_v53, %v154_v3  ;;  %vm214_vm11 = vweird.f32 %v802_v6 }
  0xb5   :  { %v806_v15 = vpop.eup %805  ;;  %v101_v17 = vsel %vm100_vm8, %v790_v42, %v97_v8  ;;  %v268_v18 = vmul.f32 %v804_v11, %v1000_v45  ;;  %v210_v25 = vsub.f32 1.0, %v209_v13  ;;  %vm273_vm12 = vweird.f32 %v804_v11  ;;  %vm215_vm14 = vmor %vm213_vm7, %vm214_vm11 }
  0xb6   :  { %v106_v22 = vsel %vm1011_vm3, %v105_v58, %v101_v17  ;;  %v156_v24 = vadd.f32 %v796_v53, %v155_v12  ;;  %v1042_v26 = vadd.f32 1.0, %v806_v15  ;;  %v808_v34 = vpop.eup %807  ;;  %v220_v42 = vor.u32 1.1754944e-38, %v219_v9  ;;  %vm274_vm0 = vmor %vm272_vm13, %vm273_vm12 }
  0xb7   :  { %v108_v27 = vmul.f32 %v792_v47, %v106_v22  ;;  %v269_v28 = vsub.f32 1.0, %v268_v18  ;;  %v211_v31 = vmul.f32 %v802_v6, %v210_v25  ;;  %v1050_v32 = vadd.f32 1.0, %v808_v34  ;;  %v545_v44 = vpop.f32.mrf.mxu0 }
  0xb8   :  { %v160_v30 = vsel %vm159_vm10, %v796_v53, %v156_v24  ;;  %811 = vrcp.f32 %v1042_v26  ;;  %v546_v56 = vadd.f32 %v545_v44, %v970_v7  ;;  %v332_v1 = vand.u32 2147483647, %v1042_v26 }
  0xb9   :  { %v109_v36 = vpack.c.bf16 %v108_v27, %v108_v27  ;;  %v165_v37 = vsel %vm1019_vm5, %v164_v0, %v160_v30  ;;  %v270_v38 = vmul.f32 %v804_v11, %v269_v28  ;;  %v212_v40 = vadd.f32 %v802_v6, %v211_v31  ;;  %v810_v49 = vpop.eup %809  ;;  %v604_v61 = vpop.f32.mrf.mxu1 }
  0xba   :  { %v167_v39 = vmul.f32 %v794_v51, %v165_v37  ;;  %813 = vpow2.f32 %v733_v29  ;;  %v373_v51 = vadd.f32 %v978_v23, %v974_v16  ;;  %v1058_v55 = vadd.f32 1.0, %v810_v49 }
  0xbb   :  { %110 = vst [vmem:[#allocation5] sm:$0xf] %v109_v36  ;;  %v271_v43 = vadd.f32 %v804_v11, %v270_v38  ;;  %v216_v47 = vsel %vm215_vm14, %v802_v6, %v212_v40  ;;  %815 = vrcp.f32 %v1050_v32  ;;  %v334_v3 = vand.u32 2147483648, %v1042_v26 }
  0xbc   :  { %v168_v46 = vpack.c.bf16 %v167_v39, %v167_v39  ;;  %v221_v50 = vsel %vm218_vm15, %v220_v42, %v216_v47  ;;  %817 = vtanh.f32 %v1008_v52  ;;  %v605_v33 = vadd.f32 %v604_v61, %v970_v7 }
  0xbd   :  { %v275_v45 = vsel %vm274_vm0, %v804_v11, %v271_v43  ;;  %v223_v53 = vmul.f32 %v1015_v57, %v221_v50  ;;  %819 = vrcp.f32 %v1058_v55  ;;  %vm328_vm3 = vweird.f32 %v1042_v26 }
  0xbe   :  { %v812_v41 = vpop.eup %811  ;;  %170 = vst [vmem:[#allocation5 + $0x4] sm:$0xf] %v168_v46  ;;  %v280_v54 = vsel %vm277_vm1, %v279_v48, %v275_v45  ;;  %821 = vtanh.f32 %v373_v51  ;;  %vm333_vm4 = vcmp.eq.f32.partialorder %v332_v1, 8.507059e+37  ;;  %v335_v10 = vor.u32 1.1754944e-38, %v334_v3 }
  0xbf   :  { %v282_v58 = vmul.f32 %v1023_v62, %v280_v54  ;;  %v324_v60 = vmul.f32 %v812_v41, %v1042_v26  ;;  %v224_v23 = vpack.c.bf16 %v223_v53, %v223_v53  ;;  %v743_v62 = vmul.f32 -1.442695, %v546_v56 }
  0xc0   :  { %v814_v63 = vpop.eup %813  ;;  %823 = vtanh.f32 %v429_v59  ;;  %vm329_vm2 = vweird.f32 %v812_v41  ;;  %v391_v13 = vand.u32 2147483647, %v1050_v32  ;;  %v393_v7 = vand.u32 2147483648, %v1050_v32 }
  0xc1   :  { %v283_v57 = vpack.c.bf16 %v282_v58, %v282_v58  ;;  %v325_v0 = vsub.f32 1.0, %v324_v60  ;;  %v816_v4 = vpop.eup %815  ;;  %226 = vst [vmem:[#allocation5 + $0x8] sm:$0xf] %v224_v23  ;;  %v1069_v52 = vadd.f32 1.0, %v814_v63  ;;  %vm330_vm5 = vmor %vm328_vm3, %vm329_vm2  ;;  %v753_v14 = vmul.f32 -1.442695, %v605_v33 }
  0xc2   :  { %v383_v6 = vmul.f32 %v816_v4, %v1050_v32  ;;  %v818_v8 = vpop.eup %817  ;;  %vm388_vm6 = vweird.f32 %v816_v4  ;;  %v488_v22 = vadd.f32 %v991_v35, %v974_v16  ;;  %v447_v24 = vand.u32 2147483647, %v1058_v55 }
  0xc3   :  { %285 = vst [vmem:[#allocation5 + $0xc] sm:$0xf] %v283_v57  ;;  %v326_v5 = vmul.f32 %v812_v41, %v325_v0  ;;  %825 = vrcp.f32 %v1069_v52  ;;  %v820_v12 = vpop.eup %819  ;;  %vm387_vm7 = vweird.f32 %v1050_v32  ;;  %vm392_vm9 = vcmp.eq.f32.partialorder %v391_v13, 8.507059e+37 }
  0xc4   :  { %v384_v11 = vsub.f32 1.0, %v383_v6  ;;  %827 = vpow2.f32 %v743_v62  ;;  %v439_v18 = vmul.f32 %v820_v12, %v1058_v55  ;;  %v822_v19 = vpop.eup %821  ;;  %vm389_vm8 = vmor %vm387_vm7, %vm388_vm6  ;;  %v394_v30 = vor.u32 1.1754944e-38, %v393_v7 }
  0xc5   :  { %v327_v9 = vadd.f32 %v812_v41, %v326_v5  ;;  %829 = vpow2.f32 %v753_v14  ;;  %vm444_vm10 = vweird.f32 %v820_v12  ;;  %v449_v31 = vand.u32 2147483648, %v1058_v55 }
  0xc6   :  { %v385_v17 = vmul.f32 %v816_v4, %v384_v11  ;;  %v824_v25 = vpop.eup %823  ;;  %v440_v28 = vsub.f32 1.0, %v439_v18  ;;  %831 = vtanh.f32 %v488_v22  ;;  %vm443_vm11 = vweird.f32 %v1058_v55 }
  0xc7   :  { %v331_v15 = vsel %vm330_vm5, %v812_v41, %v327_v9  ;;  %vm1085_vm12 = vcmp.eq.f32.partialorder %v447_v24, 8.507059e+37  ;;  %vm445_vm13 = vmor %vm443_vm11, %vm444_vm10  ;;  %v450_v47 = vor.u32 1.1754944e-38, %v449_v31  ;;  %v506_v48 = vand.u32 2147483647, %v1069_v52 }
  0xc8   :  { %v336_v20 = vsel %vm333_vm4, %v335_v10, %v331_v15  ;;  %v386_v27 = vadd.f32 %v816_v4, %v385_v17  ;;  %v441_v37 = vmul.f32 %v820_v12, %v440_v28  ;;  %v508_v49 = vand.u32 2147483648, %v1069_v52 }
  0xc9   :  { %v338_v26 = vmul.f32 %v818_v8, %v336_v20  ;;  %v826_v29 = vpop.eup %825  ;;  %vm502_vm15 = vweird.f32 %v1069_v52  ;;  %vm507_vm1 = vcmp.eq.f32.partialorder %v506_v48, 8.507059e+37  ;;  %v544_v57 = vadd.f32 %v1025_v2, %v974_v16 }
  0xca   :  { %v390_v36 = vsel %vm389_vm8, %v816_v4, %v386_v27  ;;  %v498_v35 = vmul.f32 %v826_v29, %v1069_v52  ;;  %v828_v38 = vpop.eup %827  ;;  %v442_v42 = vadd.f32 %v820_v12, %v441_v37  ;;  %vm503_vm14 = vweird.f32 %v826_v29 }
  0xcb   :  { %v339_v34 = vpack.c.bf16 %v338_v26, %v338_v26  ;;  %v395_v39 = vsel %vm392_vm9, %v394_v30, %v390_v36  ;;  %v552_v44 = vadd.f32 1.0, %v828_v38  ;;  %v830_v46 = vpop.eup %829  ;;  %vm504_vm0 = vmor %vm502_vm15, %vm503_vm14  ;;  %v509_v58 = vor.u32 1.1754944e-38, %v508_v49 }
  0xcc   :  { %v397_v32 = vmul.f32 %v822_v19, %v395_v39  ;;  %v499_v43 = vsub.f32 1.0, %v498_v35  ;;  %v446_v45 = vsel %vm445_vm13, %v820_v12, %v442_v42  ;;  %v611_v55 = vadd.f32 1.0, %v830_v46  ;;  %v832_v56 = vpop.eup %831 }
  0xcd   :  { %341 = vst [vmem:[#allocation5 + $0x10] sm:$0xf] %v339_v34  ;;  %833 = vrcp.f32 %v552_v44  ;;  %v451_v41 = vsel %vm1085_vm12, %v450_v47, %v446_v45  ;;  %v603_v52 = vadd.f32 %v1038_v21, %v974_v16  ;;  %v562_v62 = vand.u32 2147483647, %v552_v44 }
  0xce   :  { %v398_v50 = vpack.c.bf16 %v397_v32, %v397_v32  ;;  %v500_v51 = vmul.f32 %v826_v29, %v499_v43  ;;  %v453_v53 = vmul.f32 %v824_v25, %v451_v41  ;;  %835 = vrcp.f32 %v611_v55 }
  0xcf   :  { %837 = vtanh.f32 %v544_v57  ;;  %v564_v33 = vand.u32 2147483648, %v552_v44  ;;  %vm558_vm3 = vweird.f32 %v552_v44  ;;  %vm563_vm5 = vcmp.eq.f32.partialorder %v562_v62, 8.507059e+37 }
  0xd0   :  { %400 = vst [vmem:[#allocation5 + $0x14] sm:$0xf] %v398_v50  ;;  %v501_v54 = vadd.f32 %v826_v29, %v500_v51  ;;  %v454_v59 = vpack.c.bf16 %v453_v53, %v453_v53  ;;  %839 = vtanh.f32 %v603_v52  ;;  %v623_v10 = vand.u32 2147483648, %v611_v55 }
  0xd1   :  { %v565_v2 = vor.u32 1.1754944e-38, %v564_v33  ;;  %v621_v13 = vand.u32 2147483647, %v611_v55  ;;  %vm617_vm7 = vweird.f32 %v611_v55 }
  0xd2   :  { %v505_v60 = vsel %vm504_vm0, %v826_v29, %v501_v54  ;;  %456 = vst [vmem:[#allocation5 + $0x18] sm:$0xf] %v454_v59  ;;  %v624_v15 = vor.u32 1.1754944e-38, %v623_v10 }
  0xd3   :  { %v510_v61 = vsel %vm507_vm1, %v509_v58, %v505_v60  ;;  %v834_v23 = vpop.eup %833  ;;  %vm622_vm9 = vcmp.eq.f32.partialorder %v621_v13, 8.507059e+37 }
  0xd4   :  { %v512_v63 = vmul.f32 %v832_v56, %v510_v61  ;;  %v554_v0 = vmul.f32 %v834_v23, %v552_v44  ;;  %v836_v4 = vpop.eup %835  ;;  %vm559_vm2 = vweird.f32 %v834_v23 }
  0xd5   :  { %v613_v6 = vmul.f32 %v836_v4, %v611_v55  ;;  %vm560_vm4 = vmor %vm558_vm3, %vm559_vm2  ;;  %vm618_vm6 = vweird.f32 %v836_v4  ;;  %v838_v7 = vpop.eup %837 }
  0xd6   :  { %v513_v1 = vpack.c.bf16 %v512_v63, %v512_v63  ;;  %v555_v3 = vsub.f32 1.0, %v554_v0  ;;  %vm619_vm8 = vmor %vm617_vm7, %vm618_vm6  ;;  %v840_v19 = vpop.eup %839 }
  0xd7   :  { %v614_v9 = vsub.f32 1.0, %v613_v6 }
  0xd8   :  { %515 = vst [vmem:[#allocation5 + $0x1c] sm:$0xf] %v513_v1  ;;  %v556_v5 = vmul.f32 %v834_v23, %v555_v3 }
  0xd9   :  { %v615_v12 = vmul.f32 %v836_v4, %v614_v9 }
  0xda   :  { %v557_v8 = vadd.f32 %v834_v23, %v556_v5 }
  0xdb   :  { %v616_v21 = vadd.f32 %v836_v4, %v615_v12 }
  0xdc   :  { %v561_v11 = vsel %vm560_vm4, %v834_v23, %v557_v8 }
  0xdd   :  { %v566_v14 = vsel %vm563_vm5, %v565_v2, %v561_v11  ;;  %v620_v18 = vsel %vm619_vm8, %v836_v4, %v616_v21 }
  0xde   :  { %v568_v16 = vmul.f32 %v838_v7, %v566_v14  ;;  %v625_v20 = vsel %vm622_vm9, %v624_v15, %v620_v18 }
  0xdf   :  { %v627_v22 = vmul.f32 %v840_v19, %v625_v20 }
  0xe0   :  { %v569_v17 = vpack.c.bf16 %v568_v16, %v568_v16 }
  0xe1   :  { %v628_v24 = vpack.c.bf16 %v627_v22, %v627_v22 }
  0xe2   :  { %571 = vst [vmem:[#allocation5 + $0x20] sm:$0xf] %v569_v17 }
  0xe3   :  { %630 = vst [vmem:[#allocation5 + $0x24] sm:$0xf] %v628_v24 }
  0xe4   :  { %643 = dma.vmem_to_hbm [thread:$0]  %s636_s23, 640, %s638_s26, [#allocation4], %s894_s17, %s894_s17, %s895_s18  }
  0xe5   :  { %891 = dma.done.wait [#allocation4], 640  }
  0xe6   :  { %892 = vsyncadd [#allocation4], 4294966656 }
  0xe7   :  { %648 = vsyncpa [#allocation3], 1 }
  0xe8   :  { %649 = vsyncpa [#allocation4], 1 }

</bundles_post_ra>
